<compile_context>
chip_gen: v7x
topology: tpu7x:2x2x1
jax: 0.10.0
libtpu: 0.0.40
codegen_flags: <defaults>
</compile_context>

<pallas_src>
import functools

import jax
import jax.numpy as jnp
from jax.experimental import pallas as pl
from jax.experimental.pallas import tpu as pltpu

_HP = 32  # padded feature dim (>= max(input_size, 16, 32, 2))


def _mlp_kernel(x_ref, w_ref, b_ref, o_ref):
    """One batch tile of the 3-layer MLP, batch on the lane dimension.

    x_ref: (IN, TB)        input tile, batch on lanes
    w_ref: (3, 32, 32)     transposed, zero-padded weights (out_pad, in_pad)
    b_ref: (3, 32, 1)      zero-padded biases
    o_ref: (2, TB)         output tile
    """
    x = x_ref[...]                       # (IN, TB) f32
    in_features = x.shape[0]
    out_features = o_ref.shape[0]

    # --- Layer 1: Linear(in -> 16) + ReLU. K == in_features is tiny, so use
    # the VPU (broadcasted multiply-adds) rather than a K=2 MXU contraction.
    w1 = w_ref[0]                        # (32, 32): rows 0:16 / cols 0:IN valid, rest 0
    h = b_ref[0]                         # (32, 1), broadcasts over lanes
    for j in range(in_features):         # static, unrolled (in_features == 2)
        h = h + w1[:, j:j + 1] * x[j:j + 1, :]
    h1 = jnp.maximum(h, 0.0)             # (32, TB); rows >= 16 are exactly 0

    # --- Layer 2: Linear(16 -> 32) + ReLU on the MXU (zero-padded K rows of h1
    # multiply zero-padded columns of w2, so padding is a no-op).
    h2 = jnp.dot(w_ref[1], h1, preferred_element_type=jnp.float32) + b_ref[1]
    h2 = jnp.maximum(h2, 0.0)            # (32, TB)

    # --- Layer 3: Linear(32 -> 2): padded matmul, keep the 2 valid rows.
    y = jnp.dot(w_ref[2], h2, preferred_element_type=jnp.float32) + b_ref[2]
    o_ref[...] = y[0:out_features, :].astype(o_ref.dtype)


def _pack_params(params):
    """Pack the 3 (w, b) pairs into two padded, transposed slabs."""

    def pad_w(w):                        # (in, out) -> (HP, HP) as (out_pad, in_pad)
        wt = w.T
        return jnp.pad(wt, ((0, _HP - wt.shape[0]), (0, _HP - wt.shape[1])))

    def pad_b(b):                        # (out,) -> (HP, 1)
        b = b.reshape(-1)
        return jnp.pad(b, (0, _HP - b.shape[0]))[:, None]

    W = jnp.stack([pad_w(params["w1"]), pad_w(params["w2"]), pad_w(params["w3"])])
    B = jnp.stack([pad_b(params["b1"]), pad_b(params["b2"]), pad_b(params["b3"])])
    return W.astype(jnp.float32), B.astype(jnp.float32)


@functools.partial(jax.jit, static_argnames=("tb",))
def generator_forward(x, params, *, tb=512):
    """Forward pass of the Generator MLP via a single Pallas kernel.

    x: (batch, input_size) float32
    params: dict with w{1,2,3} of shapes (in, out) and b{1,2,3} of shape (out,)
            (weights stored transposed vs. PyTorch -> x @ W + b == PyTorch).
    returns: (batch, 2) float32
    """
    batch, in_features = x.shape
    out_features = params["w3"].shape[1]

    W, B = _pack_params(params)

    # Batch tile: a multiple of 128 lanes. Shrink for tiny batches (minimal
    # padded work), keep large (default 512) to amortize per-grid-step cost.
    min_tiles = -(-batch // 128)                     # ceil(batch / 128)
    tb = max(128, min(tb, min_tiles * 128))
    padded = -(-batch // tb) * tb

    # Transpose so batch sits on the lane dimension; zero-pad the tail lanes.
    xt = jnp.zeros((in_features, padded), jnp.float32).at[:, :batch].set(x.T)

    out_t = pl.pallas_call(
        _mlp_kernel,
        out_shape=jax.ShapeDtypeStruct((out_features, padded), jnp.float32),
        grid=(padded // tb,),
        in_specs=[
            pl.BlockSpec((in_features, tb), lambda i: (0, i)),
            pl.BlockSpec((3, _HP, _HP), lambda i: (0, 0, 0)),  # VMEM-resident weights
            pl.BlockSpec((3, _HP, 1), lambda i: (0, 0, 0)),    # VMEM-resident biases
        ],
        out_specs=pl.BlockSpec((out_features, tb), lambda i: (0, i)),
        compiler_params=pltpu.CompilerParams(
            dimension_semantics=("parallel",)),                # shard batch over TCs (v7x)
    )(xt, W, B)

    return out_t[:, :batch].T


def init_params(key, input_size=2):
    """Deterministic init mirroring Generator.__init__ (PyTorch Linear init).

    Weights stored as (in_features, out_features); biases as (out_features,).
    """
    dims = [(input_size, 16), (16, 32), (32, 2)]
    params = {}
    for i, (fan_in, fan_out) in enumerate(dims, start=1):
        key, kw, kb = jax.random.split(key, 3)
        bound = 1.0 / (fan_in ** 0.5)
        params[f"w{i}"] = jax.random.uniform(
            kw, (fan_in, fan_out), jnp.float32, minval=-bound, maxval=bound)
        params[f"b{i}"] = jax.random.uniform(
            kb, (fan_out,), jnp.float32, minval=-bound, maxval=bound)
    return params


def reference_forward(x, params):
    """Plain-JAX reference for correctness checking."""
    h = jnp.maximum(x @ params["w1"] + params["b1"], 0.0)
    h = jnp.maximum(h @ params["w2"] + params["b2"], 0.0)
    return h @ params["w3"] + params["b3"]


# TODO(synk): loss_function / optimizer / partial_train are host-side training
# utilities (BCELoss + backward) and are out of scope for a forward kernel.

if __name__ == "__main__":
    key = jax.random.PRNGKey(0)
    key, kx = jax.random.split(key)

    input_size = 2
    batch = 8  # latent samples, analogous to Generator.generate(sample_size=8)

    params = init_params(key, input_size=input_size)
    x = jax.random.normal(kx, (batch, input_size), dtype=jnp.float32)

    out = jax.block_until_ready(generator_forward(x, params))
    ref = reference_forward(x, params)
    assert out.shape == (batch, 2), out.shape
    assert jnp.allclose(out, ref, atol=1e-5, rtol=1e-5), "mismatch vs reference (batch=8)"

    # Exercise the multi-step (grid > 1), non-multiple-of-128 path as well.
    key, kx2 = jax.random.split(key)
    x2 = jax.random.normal(kx2, (300, input_size), dtype=jnp.float32)
    out2 = jax.block_until_ready(generator_forward(x2, params, tb=128))
    ref2 = reference_forward(x2, params)
    assert out2.shape == (300, 2), out2.shape
    assert jnp.allclose(out2, ref2, atol=1e-5, rtol=1e-5), "mismatch vs reference (batch=300)"

    print("KERNEL_OK")
</pallas_src>

<mosaic_0001>
module attributes {stable_mosaic.version = 11 : i64} {
  func.func @_mlp_kernel(%arg0: i32, %arg1: memref<2x128xf32, #tpu.memory_space<vmem>>, %arg2: memref<3x32x32xf32, #tpu.memory_space<vmem>>, %arg3: memref<3x32x1xf32, #tpu.memory_space<vmem>>, %arg4: memref<2x128xf32, #tpu.memory_space<vmem>>) attributes {dimension_semantics = [#tpu.dimension_semantics<parallel>], iteration_bounds = array<i64: 1>, scalar_prefetch = 0 : i64, scratch_operands = 0 : i64, tpu.core_type = #tpu.core_type<tc>, window_params = [{transform_indices = @transform_0, window_bounds = array<i64: 2, 128>}, {pipeline_mode = #tpu.pipeline_mode<synchronous>, transform_indices = @transform_1, window_bounds = array<i64: 3, 32, 32>}, {pipeline_mode = #tpu.pipeline_mode<synchronous>, transform_indices = @transform_2, window_bounds = array<i64: 3, 32, 1>}, {transform_indices = @transform_3, window_bounds = array<i64: 2, 128>}]} {
    %c0 = arith.constant 0 : index
    %c0_0 = arith.constant 0 : index
    %0 = vector.load %arg1[%c0, %c0_0] : memref<2x128xf32, #tpu.memory_space<vmem>>, vector<2x128xf32>
    %c0_1 = arith.constant 0 : index
    %c0_2 = arith.constant 0 : index
    %c0_3 = arith.constant 0 : index
    %1 = vector.load %arg2[%c0_1, %c0_2, %c0_3] : memref<3x32x32xf32, #tpu.memory_space<vmem>>, vector<1x32x32xf32>
    %2 = vector.shape_cast %1 : vector<1x32x32xf32> to vector<32x32xf32>
    %c0_4 = arith.constant 0 : index
    %c0_5 = arith.constant 0 : index
    %c0_6 = arith.constant 0 : index
    %3 = vector.load %arg3[%c0_4, %c0_5, %c0_6] : memref<3x32x1xf32, #tpu.memory_space<vmem>>, vector<1x32x1xf32>
    %4 = vector.shape_cast %3 : vector<1x32x1xf32> to vector<32x1xf32>
    %5 = vector.extract_strided_slice %2 {offsets = [0, 0], sizes = [32, 1], strides = [1, 1]} : vector<32x32xf32> to vector<32x1xf32>
    %6 = vector.extract_strided_slice %0 {offsets = [0, 0], sizes = [1, 128], strides = [1, 1]} : vector<2x128xf32> to vector<1x128xf32>
    %7 = vector.broadcast %5 : vector<32x1xf32> to vector<32x128xf32>
    %8 = vector.broadcast %6 : vector<1x128xf32> to vector<32x128xf32>
    %9 = arith.mulf %7, %8 : vector<32x128xf32>
    %10 = vector.broadcast %4 : vector<32x1xf32> to vector<32x128xf32>
    %11 = arith.addf %10, %9 : vector<32x128xf32>
    %12 = vector.extract_strided_slice %2 {offsets = [0, 1], sizes = [32, 1], strides = [1, 1]} : vector<32x32xf32> to vector<32x1xf32>
    %13 = vector.extract_strided_slice %0 {offsets = [1, 0], sizes = [1, 128], strides = [1, 1]} : vector<2x128xf32> to vector<1x128xf32>
    %14 = vector.broadcast %12 : vector<32x1xf32> to vector<32x128xf32>
    %15 = vector.broadcast %13 : vector<1x128xf32> to vector<32x128xf32>
    %16 = arith.mulf %14, %15 : vector<32x128xf32>
    %17 = arith.addf %11, %16 : vector<32x128xf32>
    %cst = arith.constant 0.000000e+00 : f32
    %18 = vector.broadcast %cst : f32 to vector<32x128xf32>
    %19 = arith.maximumf %17, %18 : vector<32x128xf32>
    %c1 = arith.constant 1 : index
    %c0_7 = arith.constant 0 : index
    %c0_8 = arith.constant 0 : index
    %20 = vector.load %arg2[%c1, %c0_7, %c0_8] : memref<3x32x32xf32, #tpu.memory_space<vmem>>, vector<1x32x32xf32>
    %21 = vector.shape_cast %20 : vector<1x32x32xf32> to vector<32x32xf32>
    %cst_9 = arith.constant dense<0.000000e+00> : vector<32x128xf32>
    %22 = tpu.matmul %21, %19, %cst_9 {dimension_numbers = #tpu.dot_dimension_numbers<[1], [0], [0], [1], [0, 0, 1, 1], [], []>} : vector<32x32xf32>, vector<32x128xf32>, vector<32x128xf32> -> vector<32x128xf32>
    %c1_10 = arith.constant 1 : index
    %c0_11 = arith.constant 0 : index
    %c0_12 = arith.constant 0 : index
    %23 = vector.load %arg3[%c1_10, %c0_11, %c0_12] : memref<3x32x1xf32, #tpu.memory_space<vmem>>, vector<1x32x1xf32>
    %24 = vector.shape_cast %23 : vector<1x32x1xf32> to vector<32x1xf32>
    %25 = vector.broadcast %24 : vector<32x1xf32> to vector<32x128xf32>
    %26 = arith.addf %22, %25 : vector<32x128xf32>
    %cst_13 = arith.constant 0.000000e+00 : f32
    %27 = vector.broadcast %cst_13 : f32 to vector<32x128xf32>
    %28 = arith.maximumf %26, %27 : vector<32x128xf32>
    %c2 = arith.constant 2 : index
    %c0_14 = arith.constant 0 : index
    %c0_15 = arith.constant 0 : index
    %29 = vector.load %arg2[%c2, %c0_14, %c0_15] : memref<3x32x32xf32, #tpu.memory_space<vmem>>, vector<1x32x32xf32>
    %30 = vector.shape_cast %29 : vector<1x32x32xf32> to vector<32x32xf32>
    %cst_16 = arith.constant dense<0.000000e+00> : vector<32x128xf32>
    %31 = tpu.matmul %30, %28, %cst_16 {dimension_numbers = #tpu.dot_dimension_numbers<[1], [0], [0], [1], [0, 0, 1, 1], [], []>} : vector<32x32xf32>, vector<32x128xf32>, vector<32x128xf32> -> vector<32x128xf32>
    %c2_17 = arith.constant 2 : index
    %c0_18 = arith.constant 0 : index
    %c0_19 = arith.constant 0 : index
    %32 = vector.load %arg3[%c2_17, %c0_18, %c0_19] : memref<3x32x1xf32, #tpu.memory_space<vmem>>, vector<1x32x1xf32>
    %33 = vector.shape_cast %32 : vector<1x32x1xf32> to vector<32x1xf32>
    %34 = vector.broadcast %33 : vector<32x1xf32> to vector<32x128xf32>
    %35 = arith.addf %31, %34 : vector<32x128xf32>
    %36 = vector.extract_strided_slice %35 {offsets = [0, 0], sizes = [2, 128], strides = [1, 1]} : vector<32x128xf32> to vector<2x128xf32>
    %c0_20 = arith.constant 0 : index
    %c0_21 = arith.constant 0 : index
    %37 = vector.load %arg4[%c0_20, %c0_21] : memref<2x128xf32, #tpu.memory_space<vmem>>, vector<2x128xf32>
    tpu.vector_store %arg4[%c0_20, %c0_21], %36 {strides = array<i32>} : memref<2x128xf32, #tpu.memory_space<vmem>>, vector<2x128xf32>,
    return
  }
  func.func @transform_0(%arg0: i32) -> (i32, i32) {
    %c0_i32 = arith.constant 0 : i32
    %c0_i32_0 = arith.constant 0 : i32
    return %c0_i32, %arg0 : i32, i32
  }
  func.func @transform_1(%arg0: i32) -> (i32, i32, i32) {
    %c0_i32 = arith.constant 0 : i32
    %c0_i32_0 = arith.constant 0 : i32
    %c0_i32_1 = arith.constant 0 : i32
    %c0_i32_2 = arith.constant 0 : i32
    return %c0_i32, %c0_i32_0, %c0_i32_1 : i32, i32, i32
  }
  func.func @transform_2(%arg0: i32) -> (i32, i32, i32) {
    %c0_i32 = arith.constant 0 : i32
    %c0_i32_0 = arith.constant 0 : i32
    %c0_i32_1 = arith.constant 0 : i32
    %c0_i32_2 = arith.constant 0 : i32
    return %c0_i32, %c0_i32_0, %c0_i32_1 : i32, i32, i32
  }
  func.func @transform_3(%arg0: i32) -> (i32, i32) {
    %c0_i32 = arith.constant 0 : i32
    %c0_i32_0 = arith.constant 0 : i32
    return %c0_i32, %arg0 : i32, i32
  }
}

</mosaic_0001>

<bundles_post_ra>
// kernel: generator_forward.1
= control target key start
LH: loop header
LB: loop body
LE: loop exit
PB: predicated region body
PF: predicated region fallthrough
CT: control target
= control target key end

     0   :  { %v459_v0 = vmov 0   ;;  %v460_v6 = vmov 1   ;;  %vm137_vm0 = vcmask 261120   ;;  %v43_v16 = vlaneseq  ;;  %s558_s2 = inlined_call_operand.vmem [shape: f32[3,32,1], index: 2, kind: input, shape index: {}]   ;;  %s559_s1 = inlined_call_operand.vmem [shape: f32[3,32,32], index: 1, kind: input, shape index: {}]   ;;  %s560_s0 = inlined_call_operand.vmem [shape: f32[2,128], index: 0, kind: input, shape index: {}]   ;;  %s561_s3 = inlined_call_operand.vmem [shape: f32[2,128], index: 3, kind: output, shape index: {}]  }
   0x1   :  { %452 = vset.pattern.permute.xlu1 %v459_v0  ;;  %451 = vset.pattern.permute.xlu0 %v459_v0  ;;  %v19_v1 = vld [vmem:[%s558_s2] sm:$0xff]  ;;  %v20_v3 = vld [vmem:[%s558_s2 + $0x8] sm:$0xff]  ;;  %v18_v5 = vld [vmem:[%s559_s1 + $0x18] sm:$0xff] }
   0x2   :  { %v15_v2 = vld [vmem:[%s559_s1] sm:$0xff]  ;;  %53 = vperm.xlu1 %452, %v19_v1   ;;  %v16_v4 = vld [vmem:[%s559_s1 + $0x8] sm:$0xff]  ;;  %v17_v7 = vld [vmem:[%s559_s1 + $0x10] sm:$0xff]  ;;  %v44_v17 = vshrl.u32 %v43_v16, 7 }
   0x3   :  { %25 = vperm.xlu0 %451, %v15_v2   ;;  %v21_v8 = vld [vmem:[%s558_s2 + $0x10] sm:$0xff]  ;;  %v22_v9 = vld [vmem:[%s558_s2 + $0x18] sm:$0xff]  ;;  %v365_v10 = vld [vmem:[%s559_s1 + $0x20] sm:$0xff] }
   0x4   :  { %413 = vmatprep.mubr.msk.f32.mxu0 %vm137_vm0, %v365_v10  ;;  %v369_v11 = vld [vmem:[%s558_s2 + $0x20] sm:$0xff]  ;;  %v370_v12 = vld [vmem:[%s558_s2 + $0x28] sm:$0xff]  ;;  %v371_v13 = vld [vmem:[%s558_s2 + $0x30] sm:$0xff]  ;;  %v45_v20 = vsub.s32 0, %v44_v17  ;;  %v93_v21 = vsub.s32 1, %v44_v17 }
   0x5   :  { %v381_v14 = vld [vmem:[%s558_s2 + $0x40] sm:$0xff]  ;;  %v372_v15 = vld [vmem:[%s558_s2 + $0x38] sm:$0xff]  ;;  %v366_v57 = vld [vmem:[%s559_s1 + $0x28] sm:$0xff] }
   0x6   :  { %58 = vperm.xlu1 %452, %v20_v3   ;;  %v14_v22 = vld [vmem:[%s560_s0] sm:$0x3]  ;;  %v367_v58 = vld [vmem:[%s559_s1 + $0x30] sm:$0xff]  ;;  %v368_v59 = vld [vmem:[%s559_s1 + $0x38] sm:$0xff] }
   0x7   :  { %30 = vperm.xlu0 %451, %v16_v4   ;;  %v46_v25 = vrot.slane %v14_v22, %v45_v20  ;;  %v94_v26 = vrot.slane %v14_v22, %v93_v21  ;;  %v377_v60 = vld [vmem:[%s559_s1 + $0x40] sm:$0xff]  ;;  %v379_v16 = vld [vmem:[%s559_s1 + $0x50] sm:$0xff]  ;;  %v380_v17 = vld [vmem:[%s559_s1 + $0x58] sm:$0xff] }
   0x8   :  { %427 = vmatprep.mubr.msk.f32.mxu1 %vm137_vm0, %v377_v60 }
   0xa   :  { %453 = vset.pattern.permute.xlu1 %v460_v6 }
   0xb   :  { %40 = vperm.xlu0 %451, %v18_v5   ;;  %80 = vperm.xlu1 %453, %v16_v4  }
   0xf   :  { %455 = vset.pattern.permute.xlu0 %v460_v6  ;;  %454 = vset.pattern.permute.xlu1 %v459_v0 }
  0x10   :  { %76 = vperm.xlu0 %455, %v15_v2   ;;  %35 = vperm.xlu1 %454, %v17_v7  }
  0x14   :  { %84 = vperm.xlu0 %455, %v17_v7   ;;  %63 = vperm.xlu1 %454, %v21_v8  }
  0x18   :  { %458 = vset.pattern.permute.xlu0 %v459_v0  ;;  %68 = vperm.xlu1 %454, %v22_v9  }
  0x19   :  { %124 = vperm.xlu0 %458, %v370_v12  }
  0x1c   :  { %456 = vset.pattern.permute.xlu1 %v460_v6 }
  0x1d   :  { %88 = vperm.xlu1 %456, %v18_v5   ;;  %251 = vperm.xlu0 %458, %v381_v14  }
  0x21   :  { %457 = vset.pattern.permute.xlu1 %v459_v0 }
  0x22   :  { %119 = vperm.xlu1 %457, %v369_v11  }
  0x26   :  { %129 = vperm.xlu1 %457, %v371_v13  }
  0x2a   :  { %134 = vperm.xlu1 %457, %v372_v15   ;;  %v378_v15 = vld [vmem:[%s559_s1 + $0x48] sm:$0xff] }
  0x81   :  { %v54_v18 = vpop.permute.xlu1 %53 }
  0x82   :  { %v26_v19 = vpop.permute.xlu0 %25 }
  0x83   :  { %v47_v30 = vmul.f32 %v46_v25, %v26_v19 }
  0x85   :  { %v59_v23 = vpop.permute.xlu1 %58  ;;  %v71_v34 = vadd.f32 %v54_v18, %v47_v30 }
  0x86   :  { %v31_v24 = vpop.permute.xlu0 %30 }
  0x87   :  { %v48_v27 = vmul.f32 %v46_v25, %v31_v24 }
  0x89   :  { %v72_v32 = vadd.f32 %v59_v23, %v48_v27 }
  0x8a   :  { %v41_v28 = vpop.permute.xlu0 %40  ;;  %v81_v29 = vpop.permute.xlu1 %80 }
  0x8b   :  { %v96_v31 = vmul.f32 %v94_v26, %v81_v29  ;;  %v50_v48 = vmul.f32 %v46_v25, %v41_v28 }
  0x8d   :  { %v100_v35 = vadd.f32 %v96_v31, %v72_v32 }
  0x8f   :  { %v77_v33 = vpop.permute.xlu0 %76  ;;  %v36_v37 = vpop.permute.xlu1 %35  ;;  %v104_v39 = vmax.f32 %v100_v35, 0.0 }
  0x90   :  { %v95_v36 = vmul.f32 %v94_v26, %v77_v33  ;;  %v49_v44 = vmul.f32 %v46_v25, %v36_v37 }
  0x92   :  { %v99_v38 = vadd.f32 %v95_v36, %v71_v34 }
  0x93   :  { %v64_v41 = vpop.permute.xlu1 %63  ;;  %v85_v43 = vpop.permute.xlu0 %84 }
  0x94   :  { %v103_v40 = vmax.f32 %v99_v38, 0.0  ;;  %v73_v46 = vadd.f32 %v64_v41, %v49_v44  ;;  %v97_v47 = vmul.f32 %v94_v26, %v85_v43 }
  0x96   :  { %v433_v42 = vpack.c.bf16 %v104_v39, %v103_v40  ;;  %v101_v50 = vadd.f32 %v97_v47, %v73_v46 }
  0x97   :  { %v69_v45 = vpop.permute.xlu1 %68 }
  0x98   :  { %434 = vmatprep.subr.bf16.mxu0 %v433_v42  ;;  %v74_v51 = vadd.f32 %v69_v45, %v50_v48  ;;  %v105_v54 = vmax.f32 %v101_v50, 0.0  ;;  %v125_v63 = vpop.permute.xlu0 %124 }
  0x99   :  { %436 = vmatpush3.bf16.msra.mxu0 %v433_v42 }
  0x9c   :  { %v89_v49 = vpop.permute.xlu1 %88  ;;  %v252_v19 = vpop.permute.xlu0 %251 }
  0x9d   :  { %v98_v52 = vmul.f32 %v94_v26, %v89_v49 }
  0x9f   :  { %v102_v53 = vadd.f32 %v98_v52, %v74_v51 }
  0xa1   :  { %v106_v55 = vmax.f32 %v102_v53, 0.0  ;;  %v120_v61 = vpop.permute.xlu1 %119 }
  0xa3   :  { %v437_v56 = vpack.c.bf16 %v106_v55, %v105_v54 }
  0xa5   :  { %438 = vmatprep.subr.bf16.mxu0 %v437_v56  ;;  %v130_v62 = vpop.permute.xlu1 %129 }
  0xa6   :  { %440 = vmatpush3.bf16.msra.mxu0 %v437_v56 }
  0xa9   :  { %414 = vmatmul.mubr.msk.f32.vlgmr.msra.gmra.mrb[0].mxu0 %vm137_vm0, %v366_v57  ;;  %v135_v5 = vpop.permute.xlu1 %134 }
  0xaa   :  { %416 = vmatprep.mubr.msk.f32.mxu0 %vm137_vm0, %v367_v58 }
  0xad   :  { %417 = vmatmul.mubr.msk.f32.gmra.mrb[2].mxu0 %vm137_vm0, %v368_v59 }
 0x17c   :  { %v415_v0 = vpop.f32.mrb[0].mxu0 }
 0x17d   :  { %v222_v1 = vadd.f32 %v415_v0, %v125_v63  ;;  %v216_v2 = vpop.f32.mrb[1].mxu0 }
 0x17e   :  { %v217_v3 = vadd.f32 %v216_v2, %v120_v61 }
 0x17f   :  { %v236_v4 = vmax.f32 %v222_v1, 0.0 }
 0x180   :  { %v235_v6 = vmax.f32 %v217_v3, 0.0  ;;  %v418_v7 = vpop.f32.mrb[2].mxu0 }
 0x181   :  { %v232_v8 = vadd.f32 %v418_v7, %v135_v5  ;;  %v226_v9 = vpop.f32.mrb[3].mxu0 }
 0x182   :  { %v227_v10 = vadd.f32 %v226_v9, %v130_v62  ;;  %v441_v11 = vpack.c.bf16 %v236_v4, %v235_v6 }
 0x183   :  { %v238_v12 = vmax.f32 %v232_v8, 0.0 }
 0x184   :  { %v237_v13 = vmax.f32 %v227_v10, 0.0  ;;  %442 = vmatprep.subr.bf16.mxu1 %v441_v11 }
 0x185   :  { %444 = vmatpush3.bf16.msra.mxu1 %v441_v11 }
 0x186   :  { %v445_v14 = vpack.c.bf16 %v238_v12, %v237_v13 }
 0x188   :  { %446 = vmatprep.subr.bf16.mxu1 %v445_v14 }
 0x189   :  { %448 = vmatpush3.bf16.msra.mxu1 %v445_v14 }
 0x18c   :  { %428 = vmatmul.mubr.msk.f32.vlgmr.msra.gmra.mrb[0].mxu1 %vm137_vm0, %v378_v15 }
 0x18d   :  { %430 = vmatprep.mubr.msk.f32.mxu1 %vm137_vm0, %v379_v16 }
 0x190   :  { %431 = vmatmul.mubr.msk.f32.gmra.mrb[2].mxu1 %vm137_vm0, %v380_v17 }
 0x25f   :  { %v429_v18 = vpop.f32.mrb[0].mxu1 }
 0x260   :  { %v344_v20 = vpop.f32.mrb[1].mxu1 }
 0x261   :  { %v345_v21 = vadd.f32 %v344_v20, %v252_v19 }
 0x263   :  { %360 = vst [vmem:[%s561_s3] sm:$0x3] %v345_v21  ;;  %v432_v22 = vpop.f32.mrb[2].mxu1 }
 0x264   :  { %v353_v23 = vpop.f32.mrb[3].mxu1 }

</bundles_post_ra>
